<compile_context>
chip_gen: v5e
topology: v5e:2x2
jax: 0.10.0
libtpu: 0.0.40
codegen_flags: <defaults>
</compile_context>

<pallas_src>
import jax
import jax.numpy as jnp
from jax.experimental import pallas as pl
from jax.experimental.pallas import tpu as pltpu

_VMEM_LIMIT = 32 * 1024 * 1024  # explicit scoped-VMEM budget (v5e default is only 16 MiB)


def _pick_row_tile(rows, cap=512):
    """Largest divisor of `rows` that is <= cap and a multiple of 16 (bf16-tile safe)."""
    for t in range(min(rows, cap), 15, -1):
        if rows % t == 0 and t % 16 == 0:
            return t
    return rows


# ---------------------------------------------------------------------------
# Pallas kernel 1: fused grayscale + patchify + linear embed
# ---------------------------------------------------------------------------


def fused_patch_embed(patches, w_big, b_eff):
    """(R, K) bf16 @ (K, Dp) bf16 + (1, Dp) f32 -> tanh -> (R, Dp) bf16.

    The grayscale conversion (0.5*x+0.5 channel mean) is folded into
    w_big / b_eff by the caller, so this single MXU matmul IS the whole
    grayscale -> patchify -> embed path (no intermediate gray image in HBM).
    """
    R, K = patches.shape
    Dp = w_big.shape[1]
    tr = _pick_row_tile(R)

    def kernel(p_ref, w_ref, b_ref, o_ref):
        acc = jnp.dot(p_ref[...], w_ref[...], preferred_element_type=jnp.float32)
        o_ref[...] = jnp.tanh(acc + b_ref[...]).astype(o_ref.dtype)

    return pl.pallas_call(
        kernel,
        out_shape=jax.ShapeDtypeStruct((R, Dp), jnp.bfloat16),
        grid=(R // tr,),
        in_specs=[
            pl.BlockSpec((tr, K), lambda i: (i, 0)),
            pl.BlockSpec((K, Dp), lambda i: (0, 0)),   # weights stay VMEM-resident
            pl.BlockSpec((1, Dp), lambda i: (0, 0)),
        ],
        out_specs=pl.BlockSpec((tr, Dp), lambda i: (i, 0)),  # lane-dense 128-wide stores
        compiler_params=pltpu.CompilerParams(
            dimension_semantics=("parallel",),
            vmem_limit_bytes=_VMEM_LIMIT),
    )(patches, w_big, b_eff)


# ---------------------------------------------------------------------------
# Pallas kernel 2: dual-softmax coarse matching (+ fused row/col max of conf)
# ---------------------------------------------------------------------------


def dual_softmax(f0, f1, d_real, temperature=0.1):
    """conf = softmax_col(sim) * softmax_row(sim),  sim = f0 @ f1^T / (D * T).

    Returns (conf, row_max(conf), col_max(conf)).  Single exp pass over the
    (N, N) matrix; the scale is folded into the exponent (one operand-side
    scalar), reciprocals go to the EUP with approx=True.
    """
    B, N, Dp = f0.shape
    scale = 1.0 / (float(d_real) * float(temperature))

    def kernel(f0_ref, f1_ref, conf_ref, rmax_ref, cmax_ref):
        a = f0_ref[...]                                   # (N, Dp) bf16
        b = f1_ref[...]
        sim = jax.lax.dot_general(                        # raw f0 @ f1^T, f32 acc
            a, b, (((1,), (1,)), ((), ())),
            preferred_element_type=jnp.float32)
        rm = jnp.max(sim, axis=1, keepdims=True)          # (N, 1)
        cm = jnp.max(sim, axis=0, keepdims=True)          # (1, N)
        g = jnp.max(rm)                                   # global max (scalar)
        # Single N^2 exp; max(s*x) == s*max(x) so the scale folds into the arg.
        e_row = jnp.exp((sim - rm) * scale)               # row-softmax numerator
        corr = jnp.exp((rm - g) * scale) * jnp.exp((g - cm) * scale)  # rank-1 factors
        e_col = e_row * corr                              # col-softmax numerator
        r_inv = pl.reciprocal(jnp.sum(e_row, axis=1, keepdims=True), approx=True)
        c_inv = pl.reciprocal(jnp.sum(e_col, axis=0, keepdims=True), approx=True)
        conf = (e_row * r_inv) * (e_col * c_inv)
        conf_ref[...] = conf
        rmax_ref[...] = jnp.max(conf, axis=1, keepdims=True)
        cmax_ref[...] = jnp.max(conf, axis=0, keepdims=True)

    # TODO(synk): for realistic LoFTR sizes (N ~ 4800) this per-image (N,N)
    #             block should be row/col tiled (two-pass stats) to fit v7x's
    #             64 MiB VMEM; a single block is fine at these demo shapes.
    return pl.pallas_call(
        kernel,
        out_shape=(
            jax.ShapeDtypeStruct((B, N, N), jnp.float32),
            jax.ShapeDtypeStruct((B, N, 1), jnp.float32),
            jax.ShapeDtypeStruct((B, 1, N), jnp.float32),
        ),
        grid=(B,),
        in_specs=[
            pl.BlockSpec((None, N, Dp), lambda i: (i, 0, 0)),
            pl.BlockSpec((None, N, Dp), lambda i: (i, 0, 0)),
        ],
        out_specs=(
            pl.BlockSpec((None, N, N), lambda i: (i, 0, 0)),
            pl.BlockSpec((None, N, 1), lambda i: (i, 0, 0)),
            pl.BlockSpec((None, 1, N), lambda i: (i, 0, 0)),
        ),
        compiler_params=pltpu.CompilerParams(
            dimension_semantics=("parallel",),
            vmem_limit_bytes=_VMEM_LIMIT),
    )(f0, f1)


# ---------------------------------------------------------------------------
# Plain-JAX glue
# ---------------------------------------------------------------------------


def weighted_procrustes(X, Y, w):
    """Weighted Kabsch alignment:  Y ~= R @ X + t.  Returns 4x4 Rt."""
    # TODO(synk): align_cpa_ransac's RANSAC schedule has no static-shape Pallas
    #             equivalent; weighted Procrustes (its inner solver) is used.
    wn = w / (jnp.sum(w) + 1e-8)
    cx = jnp.sum(wn[:, None] * X, axis=0)
    cy = jnp.sum(wn[:, None] * Y, axis=0)
    Xc = X - cx
    Yc = Y - cy
    cov = (Xc * wn[:, None]).T @ Yc                       # (3, 3)
    U, S, Vt = jnp.linalg.svd(cov)
    d = jnp.sign(jnp.linalg.det(Vt.T @ U.T))
    D = jnp.diag(jnp.array([1.0, 1.0, 1.0]) * jnp.array([1.0, 1.0, d]))
    R = Vt.T @ D @ U.T
    t = cy - R @ cx
    Rt = jnp.eye(4, dtype=X.dtype)
    Rt = Rt.at[:3, :3].set(R).at[:3, 3].set(t)
    return Rt


# ---------------------------------------------------------------------------
# PairwiseLoFTR forward (num_steps == 1, fine == False analog)
# ---------------------------------------------------------------------------


def pairwise_loftr_forward(rgbs, K, deps, params, *, stride=4, n_match=8,
                           temperature=0.1):
    B, C, H, W = rgbs[0].shape
    Hc, Wc = H // stride, W // stride
    N = Hc * Wc
    P = stride * stride
    D = params["w"].shape[1]
    Dp = ((D + 127) // 128) * 128             # lane-dense (multiple-of-128) feature dim

    # --- fold grayscale normalisation into the embed weights (host-side once)
    #   gray_patch = (0.5 / C) * sum_c rgb_patch + 0.5
    #   tanh(gray_patch @ W + b) == tanh(rgb_patch_flat @ W_big + b_eff)
    w = params["w"].astype(jnp.float32)
    b = params["b"].astype(jnp.float32)
    w_big = jnp.tile(w * (0.5 / C), (C, 1))                       # (C*P, D)
    b_eff = b + 0.5 * jnp.sum(w, axis=0, keepdims=True)           # (1, D)
    w_big = jnp.pad(w_big, ((0, 0), (0, Dp - D))).astype(jnp.bfloat16)
    b_eff = jnp.pad(b_eff, ((0, 0), (0, Dp - D)))                 # f32; pads stay 0

    # --- patchify raw RGB (single XLA rearrangement; no gray image in HBM) ---
    def patchify(x):
        p = x.reshape(B, C, Hc, stride, Wc, stride)
        p = p.transpose(0, 2, 4, 1, 3, 5)                         # (B,Hc,Wc,C,s,s)
        return p.reshape(B * N, C * P)

    patches = jnp.concatenate([patchify(rgbs[0]), patchify(rgbs[1])], axis=0)
    patches = patches.astype(jnp.bfloat16)                        # halve DMA bytes

    # --- fused grayscale + embed (Pallas, one call covers both images) -------
    feats = fused_patch_embed(patches, w_big, b_eff)              # (2*B*N, Dp) bf16
    f0 = feats[:B * N].reshape(B, N, Dp)
    f1 = feats[B * N:].reshape(B, N, Dp)

    # --- dual-softmax coarse matching (Pallas) --------------------------------
    conf, rmax, cmax = dual_softmax(f0, f1, d_real=D, temperature=temperature)

    # coarse keypoint pixel coordinates (x, y), flatten order n = h * Wc + w
    xs = jnp.arange(Wc, dtype=jnp.float32) * stride
    ys = jnp.arange(Hc, dtype=jnp.float32) * stride
    gx, gy = jnp.meshgrid(xs, ys, indexing="xy")                  # (Hc, Wc)
    kp = jnp.stack([gx.reshape(-1), gy.reshape(-1)], axis=-1)     # (N, 2)

    Rts, corr3d_i, corr3d_j = [], [], []
    corr2d_i, corr2d_j, corr2d_w = [], [], []
    num_corr = jnp.zeros((B,), dtype=jnp.float32)

    for i in range(B):
        c = conf[i]                                               # (N, N)
        # mutual nearest neighbours with thr = 0.0; row/col maxima come straight
        # from the Pallas kernel (no extra N^2 reductions here).
        mutual = (c == rmax[i]) & (c == cmax[i]) & (c > 0.0)
        masked = jnp.where(mutual, c, 0.0)
        # TODO(synk): LoFTR keeps a dynamic number of matches; fixed top-k kept
        #             for static shapes (mirrors the n_match=500 top-k branch).
        mconf, flat_idx = jax.lax.top_k(masked.reshape(-1), n_match)
        i0 = flat_idx // N
        i1 = flat_idx % N
        mkpts0 = kp[i0]                                           # (M, 2)
        mkpts1 = kp[i1]

        # TODO(synk): the grid_sample'd per-match descriptors are only consumed
        #             by the num_steps==2 refinement; omitted in this 1-step path.

        y0i = mkpts0[:, 1].astype(jnp.int32)
        x0i = mkpts0[:, 0].astype(jnp.int32)
        y1i = mkpts1[:, 1].astype(jnp.int32)
        x1i = mkpts1[:, 0].astype(jnp.int32)
        mdep0 = deps[0][i, 0, y0i, x0i]
        mdep1 = deps[1][i, 0, y1i, x1i]

        ones = jnp.ones_like(mdep0[:, None])
        xyh0 = jnp.concatenate([mkpts0 + 0.5, ones], axis=1)      # (M, 3)
        xyh1 = jnp.concatenate([mkpts1 + 0.5, ones], axis=1)

        # TODO(synk): filter_zero dynamic boolean masking skipped; synthetic
        #             depths are strictly positive so the mask is all-true.
        Kinv = jnp.linalg.inv(K[i])
        xyz0 = (xyh0 * mdep0[:, None]) @ Kinv.T                   # (M, 3)
        xyz1 = (xyh1 * mdep1[:, None]) @ Kinv.T

        num_corr = num_corr.at[i].set(float(n_match))

        Rt = weighted_procrustes(xyz0, xyz1, mconf)
        Rts.append(jnp.stack([jnp.eye(4, dtype=Rt.dtype), Rt]))
        corr3d_i.append(xyz0)
        corr3d_j.append(xyz1)
        corr2d_i.append(mkpts0)
        corr2d_j.append(mkpts1)
        corr2d_w.append(mconf[None, :])

    output = {
        "loss": jnp.zeros((B,), dtype=jnp.float32),
        "num_corr": num_corr,
        "Rts_0": jnp.stack(Rts, axis=0),                          # (B, 2, 4, 4)
        "pw_corr_0": {(0, 1): (corr3d_i, corr3d_j, corr2d_w)},
    }
    return output


# ---------------------------------------------------------------------------
# Demo
# ---------------------------------------------------------------------------

if __name__ == "__main__":
    key = jax.random.PRNGKey(0)
    k_rgb0, k_rgb1, k_dep0, k_dep1, k_w = jax.random.split(key, 5)

    B, C, H, W = 2, 3, 16, 16
    stride, feat_dim = 4, 32
    P = stride * stride

    rgb0 = jax.random.uniform(k_rgb0, (B, C, H, W), jnp.float32, -1.0, 1.0)
    rgb1 = jax.random.uniform(k_rgb1, (B, C, H, W), jnp.float32, -1.0, 1.0)
    dep0 = jax.random.uniform(k_dep0, (B, 1, H, W), jnp.float32, 0.5, 2.0)
    dep1 = jax.random.uniform(k_dep1, (B, 1, H, W), jnp.float32, 0.5, 2.0)

    fx = 20.0
    Kmat = jnp.array([[fx, 0.0, W / 2.0],
                      [0.0, fx, H / 2.0],
                      [0.0, 0.0, 1.0]], jnp.float32)
    K = jnp.tile(Kmat[None], (B, 1, 1))

    params = {
        "w": jax.random.normal(k_w, (P, feat_dim), jnp.float32) * 0.3,
        "b": jnp.zeros((1, feat_dim), jnp.float32),
    }

    out = pairwise_loftr_forward([rgb0, rgb1], K, [dep0, dep1], params,
                                 stride=stride, n_match=8)

    jax.block_until_ready(out["Rts_0"])
    jax.block_until_ready(out["num_corr"])
    jax.block_until_ready(out["pw_corr_0"][(0, 1)][0][0])

    assert out["Rts_0"].shape == (B, 2, 4, 4)
    assert out["num_corr"].shape == (B,)
    print("KERNEL_OK")
</pallas_src>

<mosaic_0001>
module attributes {stable_mosaic.version = 11 : i64} {
  func.func @kernel(%arg0: i32, %arg1: memref<64x48xbf16, #tpu.memory_space<vmem>>, %arg2: memref<48x128xbf16, #tpu.memory_space<vmem>>, %arg3: memref<1x128xf32, #tpu.memory_space<vmem>>, %arg4: memref<64x128xbf16, #tpu.memory_space<vmem>>) attributes {dimension_semantics = [#tpu.dimension_semantics<parallel>], iteration_bounds = array<i64: 1>, scalar_prefetch = 0 : i64, scratch_operands = 0 : i64, tpu.core_type = #tpu.core_type<tc>, window_params = [{transform_indices = @transform_0, window_bounds = array<i64: 64, 48>}, {pipeline_mode = #tpu.pipeline_mode<synchronous>, transform_indices = @transform_1, window_bounds = array<i64: 48, 128>}, {pipeline_mode = #tpu.pipeline_mode<synchronous>, transform_indices = @transform_2, window_bounds = array<i64: 1, 128>}, {transform_indices = @transform_3, window_bounds = array<i64: 64, 128>}]} {
    %c0 = arith.constant 0 : index
    %c0_0 = arith.constant 0 : index
    %0 = vector.load %arg1[%c0, %c0_0] : memref<64x48xbf16, #tpu.memory_space<vmem>>, vector<64x48xbf16>
    %c0_1 = arith.constant 0 : index
    %c0_2 = arith.constant 0 : index
    %1 = vector.load %arg2[%c0_1, %c0_2] : memref<48x128xbf16, #tpu.memory_space<vmem>>, vector<48x128xbf16>
    %cst = arith.constant dense<0.000000e+00> : vector<64x128xf32>
    %2 = tpu.matmul %0, %1, %cst {dimension_numbers = #tpu.dot_dimension_numbers<[1], [0], [0], [1], [0, 0, 1, 1], [], []>} : vector<64x48xbf16>, vector<48x128xbf16>, vector<64x128xf32> -> vector<64x128xf32>
    %c0_3 = arith.constant 0 : index
    %c0_4 = arith.constant 0 : index
    %3 = vector.load %arg3[%c0_3, %c0_4] : memref<1x128xf32, #tpu.memory_space<vmem>>, vector<1x128xf32>
    %4 = vector.broadcast %3 : vector<1x128xf32> to vector<64x128xf32>
    %5 = arith.addf %2, %4 : vector<64x128xf32>
    %6 = math.tanh %5 : vector<64x128xf32>
    %7 = arith.truncf %6 : vector<64x128xf32> to vector<64x128xbf16>
    %c0_5 = arith.constant 0 : index
    %c0_6 = arith.constant 0 : index
    %8 = vector.load %arg4[%c0_5, %c0_6] : memref<64x128xbf16, #tpu.memory_space<vmem>>, vector<64x128xbf16>
    tpu.vector_store %arg4[%c0_5, %c0_6], %7 {strides = array<i32>} : memref<64x128xbf16, #tpu.memory_space<vmem>>, vector<64x128xbf16>,
    return
  }
  func.func @transform_0(%arg0: i32) -> (i32, i32) {
    %c0_i32 = arith.constant 0 : i32
    %c0_i32_0 = arith.constant 0 : i32
    return %arg0, %c0_i32 : i32, i32
  }
  func.func @transform_1(%arg0: i32) -> (i32, i32) {
    %c0_i32 = arith.constant 0 : i32
    %c0_i32_0 = arith.constant 0 : i32
    %c0_i32_1 = arith.constant 0 : i32
    return %c0_i32, %c0_i32_0 : i32, i32
  }
  func.func @transform_2(%arg0: i32) -> (i32, i32) {
    %c0_i32 = arith.constant 0 : i32
    %c0_i32_0 = arith.constant 0 : i32
    %c0_i32_1 = arith.constant 0 : i32
    return %c0_i32, %c0_i32_0 : i32, i32
  }
  func.func @transform_3(%arg0: i32) -> (i32, i32) {
    %c0_i32 = arith.constant 0 : i32
    %c0_i32_0 = arith.constant 0 : i32
    return %arg0, %c0_i32 : i32, i32
  }
}

</mosaic_0001>

<bundles_post_ra>
// kernel: tpu_custom_call.1
= control target key start
LH: loop header
LB: loop body
LE: loop exit
PB: predicated region body
PF: predicated region fallthrough
CT: control target
= control target key end

     0   :  { %s323_s0 = inlined_call_operand.vmem [shape: bf16[64,48], index: 0, kind: input, shape index: {}]   ;;  %s324_s1 = inlined_call_operand.vmem [shape: bf16[48,128], index: 1, kind: input, shape index: {}]   ;;  %s325_s2 = inlined_call_operand.vmem [shape: f32[1,128], index: 2, kind: input, shape index: {}]   ;;  %s326_s3 = inlined_call_operand.hbm [shape: bf16[64,128], index: 3, kind: output, shape index: {}]  }
   0x1   :  { %v194_v0 = vld [vmem:[%s324_s1 + $0x10] sm:$0xff]  ;;  %v193_v1 = vld [vmem:[%s324_s1 + $0x8] sm:$0xff] }
   0x2   :  { %90 = vmatpush.bf16.msra.mxu0 %v194_v0  ;;  %218 = vmatpush.bf16.msra.mxu1 %v194_v0 }
   0x3   :  { %219 = vmatpush.bf16.msra.mxu2 %v194_v0  ;;  %220 = vmatpush.bf16.msra.mxu3 %v194_v0 }
   0x4   :  { %8 = vsyncpa [#allocation3], 0  ;;  %v192_v2 = vld [vmem:[%s324_s1] sm:$0xff]  ;;  %v189_v4 = vld [vmem:[%s323_s0 + $0x8] sm:$0xff]  ;;  %vm72_vm0 = vcmask 392192   ;;  %s144_s29 = sshll.u32 %s326_s3, 4  ;;  %s145_s29 = int_to_ptr.hbm [resolvable:$true] %s144_s29 }
   0x5   :  { %v188_v3 = vld [vmem:[%s323_s0] sm:$0xff]  ;;  %v190_v5 = vld [vmem:[%s323_s0 + $0x10] sm:$0xff]  ;;  %v191_v6 = vld [vmem:[%s323_s0 + $0x18] sm:$0xff]  ;;  %s273_s0 = smov [#allocation2]   ;;  %s274_s30 = smov 64  }
   0x6   :  { %91 = vmatpush.bf16.msra.mxu0 %v193_v1  ;;  %221 = vmatpush.bf16.msra.mxu1 %v193_v1  ;;  %v230_v9 = vld [vmem:[%s325_s2] ss:$0 sm:$0xff]  ;;  %s142_s2 = sshll.u32 %s273_s0, 4  ;;  %s275_s4 = smov 4   ;;  %s143_s2 = int_to_ptr.vmem [resolvable:$true] %s142_s2 }
   0x7   :  { %222 = vmatpush.bf16.msra.mxu2 %v193_v1  ;;  %223 = vmatpush.bf16.msra.mxu3 %v193_v1 }
   0xa   :  { %92 = vmatpush.bf16.msra.mxu0 %v192_v2  ;;  %224 = vmatpush.bf16.msra.mxu1 %v192_v2 }
   0xb   :  { %225 = vmatpush.bf16.msra.mxu2 %v192_v2  ;;  %226 = vmatpush.bf16.msra.mxu3 %v192_v2 }
   0xd   :  { %184 = vmatmul.msk.bf16.vlgmr.msra.gmra.mxu0 %vm72_vm0, %v188_v3  ;;  %185 = vmatmul.msk.bf16.vlgmr.msra.gmra.mxu1 %vm72_vm0, %v189_v4 }
   0xe   :  { %186 = vmatmul.msk.bf16.vlgmr.msra.gmra.mxu2 %vm72_vm0, %v190_v5  ;;  %187 = vmatmul.msk.bf16.vlgmr.msra.gmra.mxu3 %vm72_vm0, %v191_v6 }
  0x8a   :  { %v94_v7 = vpop.f32.mrf.mxu0  ;;  %v99_v8 = vpop.f32.mrf.mxu1 }
  0x8b   :  { %v95_v10 = vadd.f32 %v230_v9, %v94_v7  ;;  %v100_v11 = vadd.f32 %v230_v9, %v99_v8 }
  0x8d   :  { %231 = vtanh.f32 %v95_v10 }
  0x8e   :  { %233 = vtanh.f32 %v100_v11 }
  0x91   :  { %v104_v12 = vpop.f32.mrf.mxu2  ;;  %v109_v13 = vpop.f32.mrf.mxu3 }
  0x92   :  { %v96_v14 = vpop.f32.mrf.mxu0  ;;  %v101_v15 = vpop.f32.mrf.mxu1  ;;  %v105_v18 = vadd.f32 %v230_v9, %v104_v12  ;;  %v110_v19 = vadd.f32 %v230_v9, %v109_v13 }
  0x93   :  { %v97_v16 = vadd.f32 %v230_v9, %v96_v14  ;;  %v102_v17 = vadd.f32 %v230_v9, %v101_v15  ;;  %v232_v22 = vpop.eup %231 }
  0x94   :  { %v234_v25 = vpop.eup %233 }
  0x95   :  { %235 = vtanh.f32 %v97_v16 }
  0x96   :  { %237 = vtanh.f32 %v102_v17 }
  0x97   :  { %239 = vtanh.f32 %v105_v18 }
  0x98   :  { %241 = vtanh.f32 %v110_v19 }
  0x99   :  { %v106_v20 = vpop.f32.mrf.mxu2  ;;  %v111_v21 = vpop.f32.mrf.mxu3 }
  0x9a   :  { %v107_v23 = vadd.f32 %v230_v9, %v106_v20  ;;  %v112_v24 = vadd.f32 %v230_v9, %v111_v21 }
  0x9b   :  { %v236_v26 = vpop.eup %235 }
  0x9c   :  { %243 = vtanh.f32 %v107_v23  ;;  %v238_v27 = vpop.eup %237  ;;  %v198_v28 = vpack.c.bf16 %v236_v26, %v232_v22 }
  0x9d   :  { %245 = vtanh.f32 %v112_v24  ;;  %v203_v29 = vpack.c.bf16 %v238_v27, %v234_v25  ;;  %v240_v30 = vpop.eup %239 }
  0x9e   :  { %199 = vst [vmem:[#allocation2] sm:$0xff] %v198_v28   ;;  %v242_v31 = vpop.eup %241 }
  0x9f   :  { %215 = vst [vmem:[#allocation2 + $0x8] sm:$0xff] %v203_v29  }
  0xa2   :  { %v244_v32 = vpop.eup %243 }
  0xa3   :  { %v246_v33 = vpop.eup %245  ;;  %v208_v34 = vpack.c.bf16 %v244_v32, %v240_v30 }
  0xa4   :  { %v213_v35 = vpack.c.bf16 %v246_v33, %v242_v31 }
  0xa5   :  { %216 = vst [vmem:[#allocation2 + $0x10] sm:$0xff] %v208_v34  }
  0xa6   :  { %217 = vst [vmem:[#allocation2 + $0x18] sm:$0xff] %v213_v35  }
  0xa7   :  { %150 = dma.vmem_to_hbm [thread:$0]  %s143_s2, 512, %s145_s29, [#allocation3], %s274_s30, %s274_s30, %s275_s4  }
  0xa8   :  { %271 = dma.done.wait [#allocation3], 512  }
  0xa9   :  { %272 = vsyncadd [#allocation3], 4294966784 }
  0xaa   :  { %155 = vsyncpa [#allocation3], 1 }

</bundles_post_ra>
